<compile_context>
chip_gen: v7x
topology: tpu7x:2x2x1
jax: 0.10.0
libtpu: 0.0.40
codegen_flags: <defaults>
</compile_context>

<pallas_src>
import functools

import jax
import jax.numpy as jnp
from jax.experimental import pallas as pl
from jax.experimental.pallas import tpu as pltpu


# ----------------------------------------------------------------------------------
# Pallas kernel
# ----------------------------------------------------------------------------------
def _patch_unembed_kernel(x_ref, o_ref):
    # x_ref block: (1, TL, C)    o_ref block: (1, C, TL)
    o_ref[0] = x_ref[0].T.astype(o_ref.dtype)


def _pick_row_tile(L, max_tile=1024):
    """Largest multiple of 128 that divides L (capped at max_tile), else full L.

    The chosen tile becomes the output block's last (lane) dim, so keeping it a
    multiple of 128 gives unmasked, lane-dense stores.  Falling back to the full
    L is always legal because a block dim equal to the full array dim is exempt
    from the (8, 128) divisibility rule.
    """
    if L <= max_tile:
        return L
    t = max_tile - (max_tile % 128)
    while t >= 128:
        if L % t == 0:
            return t
        t -= 128
    return L


# ----------------------------------------------------------------------------------
# Wrapper
# ----------------------------------------------------------------------------------
@functools.partial(jax.jit, static_argnames=("x_size",))
def patch_unembed(x, x_size):
    """PatchUnEmbed.forward: x (B, H*W, C) -> (B, C, H, W)."""
    B, L, C = x.shape
    H, W = x_size
    if L != H * W:
        raise ValueError(f"L={L} does not match x_size={x_size}")

    TL = _pick_row_tile(L)
    grid = (B, L // TL)

    out = pl.pallas_call(
        _patch_unembed_kernel,
        out_shape=jax.ShapeDtypeStruct((B, C, L), x.dtype),
        grid=grid,
        in_specs=[pl.BlockSpec((1, TL, C), lambda b, l: (b, l, 0))],
        out_specs=pl.BlockSpec((1, C, TL), lambda b, l: (b, 0, l)),
        compiler_params=pltpu.CompilerParams(
            dimension_semantics=("parallel", "parallel")),
    )(x)
    # (B, C, L) -> (B, C, H, W): metadata-only reshape, no data movement.
    return out.reshape(B, C, H, W)


# ----------------------------------------------------------------------------------
if __name__ == "__main__":
    # Small shapes consistent with the module: embed_dim=32 tokens on a 16x16 grid.
    B, H, W, C = 2, 16, 16, 32
    L = H * W

    key = jax.random.PRNGKey(0)
    x = jax.random.normal(key, (B, L, C), jnp.float32)

    out = patch_unembed(x, x_size=(H, W))
    jax.block_until_ready(out)

    # Pure-JAX reference (exact match expected: the op is pure data movement).
    ref = jnp.transpose(x, (0, 2, 1)).reshape(B, C, H, W)
    assert out.shape == (B, C, H, W)
    assert out.dtype == x.dtype
    assert jnp.array_equal(out, ref)
    print("KERNEL_OK")
</pallas_src>

<mosaic_0001>
module attributes {stable_mosaic.version = 11 : i64} {
  func.func @_patch_unembed_kernel(%arg0: i32, %arg1: i32, %arg2: memref<1x256x32xf32, #tpu.memory_space<vmem>>, %arg3: memref<1x32x256xf32, #tpu.memory_space<vmem>>) attributes {dimension_semantics = [#tpu.dimension_semantics<parallel>, #tpu.dimension_semantics<parallel>], iteration_bounds = array<i64: 2, 1>, scalar_prefetch = 0 : i64, scratch_operands = 0 : i64, tpu.core_type = #tpu.core_type<tc>, window_params = [{transform_indices = @transform_0, window_bounds = array<i64: 1, 256, 32>}, {transform_indices = @transform_1, window_bounds = array<i64: 1, 32, 256>}]} {
    %c0 = arith.constant 0 : index
    %c0_0 = arith.constant 0 : index
    %c0_1 = arith.constant 0 : index
    %0 = vector.load %arg2[%c0, %c0_0, %c0_1] : memref<1x256x32xf32, #tpu.memory_space<vmem>>, vector<1x256x32xf32>
    %1 = vector.shape_cast %0 : vector<1x256x32xf32> to vector<256x32xf32>
    %2 = tpu.transpose %1, [1, 0] : vector<256x32xf32> -> vector<32x256xf32>
    %c0_2 = arith.constant 0 : index
    %c0_3 = arith.constant 0 : index
    %c0_4 = arith.constant 0 : index
    %3 = vector.load %arg3[%c0_2, %c0_3, %c0_4] : memref<1x32x256xf32, #tpu.memory_space<vmem>>, vector<1x32x256xf32>
    %4 = vector.shape_cast %3 : vector<1x32x256xf32> to vector<32x256xf32>
    %5 = vector.shape_cast %2 : vector<32x256xf32> to vector<1x32x256xf32>
    tpu.vector_store %arg3[%c0_2, %c0_3, %c0_4], %5 {strides = array<i32>} : memref<1x32x256xf32, #tpu.memory_space<vmem>>, vector<1x32x256xf32>,
    return
  }
  func.func @transform_0(%arg0: i32, %arg1: i32) -> (i32, i32, i32) {
    %c0_i32 = arith.constant 0 : i32
    %c0_i32_0 = arith.constant 0 : i32
    return %arg0, %arg1, %c0_i32 : i32, i32, i32
  }
  func.func @transform_1(%arg0: i32, %arg1: i32) -> (i32, i32, i32) {
    %c0_i32 = arith.constant 0 : i32
    %c0_i32_0 = arith.constant 0 : i32
    return %arg0, %c0_i32, %arg1 : i32, i32, i32
  }
}

</mosaic_0001>

<bundles_post_ra>
// kernel: patch_unembed.1
= control target key start
LH: loop header
LB: loop body
LE: loop exit
PB: predicated region body
PF: predicated region fallthrough
CT: control target
= control target key end

     0   :  { %s418_s6 = smov 0   ;;  %s420_s7 = smov 0   ;;  %s489_s0 = inlined_call_operand.vmem [shape: f32[2,256,32], index: 0, kind: input, shape index: {}]   ;;  %s490_s1 = inlined_call_operand.vmem [shape: f32[2,32,256], index: 1, kind: output, shape index: {}]  }
   0x1   :  { %s422_s8 = smov 0  }
   0x2 LB: > { %s23_s9 = sadd.s32 1, %s402_s7  ;;  %p351_p0 = scmp.ge.s32.totalorder %s406_s8, 1  ;;  %s406_s8 = sphi %s422_s8, %s11_s8   ;;  %s402_s7 = sphi %s420_s7, %s492_s7   ;;  %s398_s6 = sphi %s418_s6, %s491_s6  }
   0x3   : > { %p25_p1 = scmp.ge.s32.totalorder %s23_s9, 2  ;;  %p108_p2 = scmp.lt.s32.totalorder %s406_s8, 3 }
   0x5   : > { %s494_s9 = smov (%p25_p1, %s23_s9), 0  ;;  %p109_p3 = pnand %p351_p0, %p108_p2 }
   0x6   : > { %p137_p4 = scmp.lt.s32.totalorder (!%p109_p3), %s398_s6, 1 }
   0x7   : > { %112 = sbr.rel (%p109_p3) target bundleno = 161 (0xa1), region = 24 }
   0xe   : > { %s496_s6 = smov (!%p137_p4, %s398_s6), 1 }
   0xf   : > { %s358_s10 = sshll.u32 %s496_s6, 8  ;;  %s359_s14 = sshll.u32 %s496_s6, 6 }
  0x10   : > { %s442_s13 = scalar_lea.vmem %s489_s0, %s358_s10  ;;  %s154_s17 = scalar_lea.vmem %s490_s1, %s359_s14 }
  0x11   : > { %v172_v0 = vld [vmem:[%s442_s13 + $0x80] sm:$0xff]  ;;  %v173_v2 = vld [vmem:[%s442_s13 + $0x88] sm:$0xff]  ;;  %v174_v4 = vld [vmem:[%s442_s13 + $0x90] sm:$0xff] }
  0x12   : > { %v156_v1 = vld [vmem:[%s442_s13] sm:$0xff]  ;;  %220 = vxpose.xlu1.b32.start [1/16] (narrow) %v172_v0, 32  ;;  %v157_v3 = vld [vmem:[%s442_s13 + $0x8] sm:$0xff]  ;;  %v158_v5 = vld [vmem:[%s442_s13 + $0x10] sm:$0xff] }
  0x13   : > { %188 = vxpose.xlu0.b32.start [1/16] (narrow) %v156_v1, 32  ;;  %v175_v6 = vld [vmem:[%s442_s13 + $0x98] sm:$0xff]  ;;  %v176_v8 = vld [vmem:[%s442_s13 + $0xa0] sm:$0xff]  ;;  %v177_v10 = vld [vmem:[%s442_s13 + $0xa8] sm:$0xff] }
  0x14   : > { %v159_v7 = vld [vmem:[%s442_s13 + $0x18] sm:$0xff]  ;;  %v160_v9 = vld [vmem:[%s442_s13 + $0x20] sm:$0xff]  ;;  %v161_v11 = vld [vmem:[%s442_s13 + $0x28] sm:$0xff] }
  0x15   : > { %v178_v12 = vld [vmem:[%s442_s13 + $0xb0] sm:$0xff]  ;;  %v179_v14 = vld [vmem:[%s442_s13 + $0xb8] sm:$0xff]  ;;  %v180_v16 = vld [vmem:[%s442_s13 + $0xc0] sm:$0xff] }
  0x16   : > { %221 = vxpose.xlu1.b32.cont [2/16] (narrow) %v173_v2, 32  ;;  %v162_v13 = vld [vmem:[%s442_s13 + $0x30] sm:$0xff]  ;;  %v163_v15 = vld [vmem:[%s442_s13 + $0x38] sm:$0xff]  ;;  %v164_v17 = vld [vmem:[%s442_s13 + $0x40] sm:$0xff] }
  0x17   : > { %189 = vxpose.xlu0.b32.cont [2/16] (narrow) %v157_v3, 32  ;;  %v181_v18 = vld [vmem:[%s442_s13 + $0xc8] sm:$0xff]  ;;  %v182_v20 = vld [vmem:[%s442_s13 + $0xd0] sm:$0xff]  ;;  %v183_v22 = vld [vmem:[%s442_s13 + $0xd8] sm:$0xff] }
  0x18   : > { %v165_v19 = vld [vmem:[%s442_s13 + $0x48] sm:$0xff]  ;;  %v166_v21 = vld [vmem:[%s442_s13 + $0x50] sm:$0xff]  ;;  %v167_v23 = vld [vmem:[%s442_s13 + $0x58] sm:$0xff] }
  0x19   : > { %v184_v24 = vld [vmem:[%s442_s13 + $0xe0] sm:$0xff]  ;;  %v185_v26 = vld [vmem:[%s442_s13 + $0xe8] sm:$0xff]  ;;  %v186_v28 = vld [vmem:[%s442_s13 + $0xf0] sm:$0xff] }
  0x1a   : > { %222 = vxpose.xlu1.b32.cont [3/16] (narrow) %v174_v4, 32  ;;  %v168_v25 = vld [vmem:[%s442_s13 + $0x60] sm:$0xff]  ;;  %v169_v27 = vld [vmem:[%s442_s13 + $0x68] sm:$0xff]  ;;  %v170_v29 = vld [vmem:[%s442_s13 + $0x70] sm:$0xff] }
  0x1b   : > { %190 = vxpose.xlu0.b32.cont [3/16] (narrow) %v158_v5, 32  ;;  %v187_v30 = vld [vmem:[%s442_s13 + $0xf8] sm:$0xff] }
  0x1c   : > { %v171_v31 = vld [vmem:[%s442_s13 + $0x78] sm:$0xff] }
  0x1e   : > { %223 = vxpose.xlu1.b32.cont [4/16] (narrow) %v175_v6, 32 }
  0x1f   : > { %191 = vxpose.xlu0.b32.cont [4/16] (narrow) %v159_v7, 32 }
  0x22   : > { %224 = vxpose.xlu1.b32.cont [5/16] (narrow) %v176_v8, 32 }
  0x23   : > { %192 = vxpose.xlu0.b32.cont [5/16] (narrow) %v160_v9, 32 }
  0x26   : > { %225 = vxpose.xlu1.b32.cont [6/16] (narrow) %v177_v10, 32 }
  0x27   : > { %193 = vxpose.xlu0.b32.cont [6/16] (narrow) %v161_v11, 32 }
  0x2a   : > { %226 = vxpose.xlu1.b32.cont [7/16] (narrow) %v178_v12, 32 }
  0x2b   : > { %194 = vxpose.xlu0.b32.cont [7/16] (narrow) %v162_v13, 32 }
  0x2e   : > { %227 = vxpose.xlu1.b32.cont [8/16] (narrow) %v179_v14, 32 }
  0x2f   : > { %195 = vxpose.xlu0.b32.cont [8/16] (narrow) %v163_v15, 32 }
  0x32   : > { %228 = vxpose.xlu1.b32.cont [9/16] (narrow) %v180_v16, 32 }
  0x33   : > { %196 = vxpose.xlu0.b32.cont [9/16] (narrow) %v164_v17, 32 }
  0x36   : > { %229 = vxpose.xlu1.b32.cont [10/16] (narrow) %v181_v18, 32 }
  0x37   : > { %197 = vxpose.xlu0.b32.cont [10/16] (narrow) %v165_v19, 32 }
  0x3a   : > { %230 = vxpose.xlu1.b32.cont [11/16] (narrow) %v182_v20, 32 }
  0x3b   : > { %198 = vxpose.xlu0.b32.cont [11/16] (narrow) %v166_v21, 32 }
  0x3e   : > { %231 = vxpose.xlu1.b32.cont [12/16] (narrow) %v183_v22, 32 }
  0x3f   : > { %199 = vxpose.xlu0.b32.cont [12/16] (narrow) %v167_v23, 32 }
  0x42   : > { %232 = vxpose.xlu1.b32.cont [13/16] (narrow) %v184_v24, 32 }
  0x43   : > { %200 = vxpose.xlu0.b32.cont [13/16] (narrow) %v168_v25, 32 }
  0x46   : > { %233 = vxpose.xlu1.b32.cont [14/16] (narrow) %v185_v26, 32 }
  0x47   : > { %201 = vxpose.xlu0.b32.cont [14/16] (narrow) %v169_v27, 32 }
  0x4a   : > { %234 = vxpose.xlu1.b32.cont [15/16] (narrow) %v186_v28, 32 }
  0x4b   : > { %202 = vxpose.xlu0.b32.cont [15/16] (narrow) %v170_v29, 32 }
  0x4e   : > { %235 = vxpose.xlu1.b32.end [16/16] (narrow) %v187_v30, 32 }
  0x4f   : > { %203 = vxpose.xlu0.b32.end [16/16] (narrow) %v171_v31, 32 }
  0x92   : > { %v236_v32 = vpop.trf.xlu1 }
  0x93   : > { %v204_v33 = vpop.trf.xlu0  ;;  %253 = vst [vmem:[%s154_s17 + $0x8] sm:$0xff] %v236_v32 }
  0x94   : > { %252 = vst [vmem:[%s154_s17] sm:$0xff] %v204_v33 }
  0x96   : > { %v237_v34 = vpop.trf.xlu1 }
  0x97   : > { %v205_v35 = vpop.trf.xlu0  ;;  %255 = vst [vmem:[%s154_s17 + $0x18] sm:$0xff] %v237_v34 }
  0x98   : > { %254 = vst [vmem:[%s154_s17 + $0x10] sm:$0xff] %v205_v35 }
  0x9a   : > { %v238_v36 = vpop.trf.xlu1 }
  0x9b   : > { %v206_v37 = vpop.trf.xlu0  ;;  %257 = vst [vmem:[%s154_s17 + $0x28] sm:$0xff] %v238_v36 }
  0x9c   : > { %256 = vst [vmem:[%s154_s17 + $0x20] sm:$0xff] %v206_v37 }
  0x9e   : > { %v239_v38 = vpop.trf.xlu1 }
  0x9f   : > { %v207_v39 = vpop.trf.xlu0  ;;  %259 = vst [vmem:[%s154_s17 + $0x38] sm:$0xff] %v239_v38 }
  0xa0   : > { %258 = vst [vmem:[%s154_s17 + $0x30] sm:$0xff] %v207_v39 }
  0xa1 PF: > { %s11_s8 = sadd.s32 1, %s406_s8   ;;  %s491_s6 = smov %s402_s7 }
  0xa2   : > { %p8_p5 = scmp.ge.s32.totalorder %s11_s8, 4   ;;  %s492_s7 = smov %s494_s9 }
  0xa4   :  { %10 = sbr.rel (!%p8_p5) target bundleno = 2 (0x2), region = 54 }

</bundles_post_ra>
